<compile_context>
chip_gen: v6e
topology: v6e:2x2x1
jax: 0.10.0
libtpu: 0.0.40
codegen_flags: <defaults>
</compile_context>

<pallas_src>
import functools

import jax
import jax.numpy as jnp
from jax.experimental import pallas as pl
from jax.experimental.pallas import tpu as pltpu

LN_EPS = 1e-5  # PyTorch nn.LayerNorm default

# Conservative VMEM budgets (bytes) that work across v5e / v6e / v7x (64 MiB).
_VMEM_TILE_BUDGET = 36 * 1024 * 1024
_VMEM_LIMIT_BYTES = 48 * 1024 * 1024


def _round_up(x, m):
    return (x + m - 1) // m * m


def _pick_block_rows(n, d_in, hidden, d_out, x_bytes, w_bytes,
                     budget=_VMEM_TILE_BUDGET):
    """Largest row tile (multiple of 8) whose resident buffers fit the budget."""
    # Weights + LN params stay resident (constant index_map -> fetched once).
    resident = (d_in * hidden + hidden * d_out) * w_bytes + 4 * hidden * 4
    cap = max(8, _round_up(n, 8))  # no point tiling past the (padded) row count
    for tm in (1024, 512, 256, 128, 64, 32, 16, 8):
        tm_eff = min(tm, cap)
        per_rows = tm_eff * (
            2 * d_in * x_bytes       # x tile, double-buffered
            + 2 * d_out * x_bytes    # out tile, double-buffered
            + 2 * hidden * 4         # f32 intermediate h (+ temporaries)
        )
        if resident + per_rows <= budget:
            return tm_eff
    return 8


def ffn_kernel(x_ref, w1_ref, b1_ref, g_ref, beta_ref, w2_ref, b2_ref, o_ref):
    """One row-tile of the position-wise FFN.

    x_ref:   (TM, D_in)
    w1_ref:  (D_in, H)    b1_ref: (1, H)
    g_ref:   (1, H)       beta_ref: (1, H)     (LayerNorm affine params)
    w2_ref:  (H, D_out)   b2_ref: (1, D_out)
    o_ref:   (TM, D_out)
    """
    # Linear 1: native-dtype operands on the MXU, f32 accumulation.
    h = jnp.dot(x_ref[...], w1_ref[...], preferred_element_type=jnp.float32)
    h = h + b1_ref[...].astype(jnp.float32)

    # Dropout: identity in eval mode.

    # LayerNorm over the hidden (last) dim -- keep in f32.
    mean = jnp.mean(h, axis=-1, keepdims=True)
    var = jnp.mean(jnp.square(h - mean), axis=-1, keepdims=True)
    h = (h - mean) * jax.lax.rsqrt(var + LN_EPS)
    h = h * g_ref[...].astype(jnp.float32) + beta_ref[...].astype(jnp.float32)

    # ReLU
    h = jnp.maximum(h, 0.0)

    # Linear 2: cast activation back to weight dtype for the native MXU path.
    out = jnp.dot(h.astype(w2_ref.dtype), w2_ref[...],
                  preferred_element_type=jnp.float32)
    out = out + b2_ref[...].astype(jnp.float32)

    o_ref[...] = out.astype(o_ref.dtype)


@functools.partial(jax.jit, static_argnames=("block_rows",))
def position_wise_ffn(x, w1, b1, gamma, beta, w2, b2, *, block_rows=None):
    """x: [batch, seq, D_in] -> [batch, seq, D_out]."""
    batch, seq, d_in = x.shape
    hidden = w1.shape[1]
    d_out = w2.shape[1]
    n = batch * seq

    if block_rows is None:
        block_rows = _pick_block_rows(
            n, d_in, hidden, d_out,
            jnp.dtype(x.dtype).itemsize, jnp.dtype(w1.dtype).itemsize)

    x2d = x.reshape(n, d_in)

    # Ragged N: pad rows up to a multiple of block_rows, slice back afterwards.
    n_pad = _round_up(n, block_rows)
    if n_pad != n:
        x2d = jnp.pad(x2d, ((0, n_pad - n), (0, 0)))

    b1_2d = b1.reshape(1, hidden)
    g_2d = gamma.reshape(1, hidden)
    beta_2d = beta.reshape(1, hidden)
    b2_2d = b2.reshape(1, d_out)

    grid = (n_pad // block_rows,)

    out2d = pl.pallas_call(
        ffn_kernel,
        out_shape=jax.ShapeDtypeStruct((n_pad, d_out), x.dtype),
        grid_spec=pltpu.PrefetchScalarGridSpec(
            num_scalar_prefetch=0,
            grid=grid,
            in_specs=[
                pl.BlockSpec((block_rows, d_in), lambda i: (i, 0)),   # x row tile
                pl.BlockSpec((d_in, hidden), lambda i: (0, 0)),       # W1 (resident)
                pl.BlockSpec((1, hidden), lambda i: (0, 0)),          # b1
                pl.BlockSpec((1, hidden), lambda i: (0, 0)),          # LN gamma
                pl.BlockSpec((1, hidden), lambda i: (0, 0)),          # LN beta
                pl.BlockSpec((hidden, d_out), lambda i: (0, 0)),      # W2 (resident)
                pl.BlockSpec((1, d_out), lambda i: (0, 0)),           # b2
            ],
            out_specs=pl.BlockSpec((block_rows, d_out), lambda i: (i, 0)),
        ),
        compiler_params=pltpu.CompilerParams(
            dimension_semantics=("parallel",),
            vmem_limit_bytes=_VMEM_LIMIT_BYTES,
        ),
    )(x2d, w1, b1_2d, g_2d, beta_2d, w2, b2_2d)

    if n_pad != n:
        out2d = out2d[:n]
    return out2d.reshape(batch, seq, d_out)


def reference_ffn(x, w1, b1, gamma, beta, w2, b2):
    """Pure-JAX reference matching the PyTorch forward (eval mode)."""
    hp = jax.lax.Precision.HIGHEST
    h = jnp.dot(x, w1, precision=hp) + b1
    mean = jnp.mean(h, axis=-1, keepdims=True)
    var = jnp.mean(jnp.square(h - mean), axis=-1, keepdims=True)
    h = (h - mean) * jax.lax.rsqrt(var + LN_EPS)
    h = h * gamma + beta
    h = jnp.maximum(h, 0.0)
    return jnp.dot(h, w2, precision=hp) + b2


if __name__ == "__main__":
    # Small but lane-dense shapes consistent with the module
    # (hidden_size defaults to 512 in the PyTorch ctor).
    batch, seq = 2, 8
    input_dim, hidden_size, output_dim = 128, 512, 128

    key = jax.random.PRNGKey(0)
    kx, kw1, kb1, kw2, kb2 = jax.random.split(key, 5)

    x = jax.random.normal(kx, (batch, seq, input_dim), dtype=jnp.float32)

    # init_weight(): uniform(-0.1, 0.1) for Linear weights. Stored as (in, out).
    w1 = jax.random.uniform(kw1, (input_dim, hidden_size), jnp.float32, -0.1, 0.1)
    b1 = jax.random.uniform(kb1, (hidden_size,), jnp.float32, -0.1, 0.1)
    w2 = jax.random.uniform(kw2, (hidden_size, output_dim), jnp.float32, -0.1, 0.1)
    b2 = jax.random.uniform(kb2, (output_dim,), jnp.float32, -0.1, 0.1)
    # LayerNorm default affine params
    gamma = jnp.ones((hidden_size,), jnp.float32)
    beta = jnp.zeros((hidden_size,), jnp.float32)

    out = position_wise_ffn(x, w1, b1, gamma, beta, w2, b2)
    out = jax.block_until_ready(out)

    ref = reference_ffn(x, w1, b1, gamma, beta, w2, b2)
    assert out.shape == (batch, seq, output_dim), out.shape
    max_err = jnp.max(jnp.abs(out - ref))
    assert jnp.allclose(out, ref, atol=2e-4, rtol=2e-4), \
        f"max abs err = {max_err}"

    print("KERNEL_OK")
</pallas_src>

<mosaic_0001>
module attributes {stable_mosaic.version = 11 : i64} {
  func.func @ffn_kernel(%arg0: i32, %arg1: memref<16x128xf32, #tpu.memory_space<vmem>>, %arg2: memref<128x512xf32, #tpu.memory_space<vmem>>, %arg3: memref<1x512xf32, #tpu.memory_space<vmem>>, %arg4: memref<1x512xf32, #tpu.memory_space<vmem>>, %arg5: memref<1x512xf32, #tpu.memory_space<vmem>>, %arg6: memref<512x128xf32, #tpu.memory_space<vmem>>, %arg7: memref<1x128xf32, #tpu.memory_space<vmem>>, %arg8: memref<16x128xf32, #tpu.memory_space<vmem>>) attributes {dimension_semantics = [#tpu.dimension_semantics<parallel>], iteration_bounds = array<i64: 1>, scalar_prefetch = 0 : i64, scratch_operands = 0 : i64, tpu.core_type = #tpu.core_type<tc>, window_params = [{transform_indices = @transform_0, window_bounds = array<i64: 16, 128>}, {pipeline_mode = #tpu.pipeline_mode<synchronous>, transform_indices = @transform_1, window_bounds = array<i64: 128, 512>}, {pipeline_mode = #tpu.pipeline_mode<synchronous>, transform_indices = @transform_2, window_bounds = array<i64: 1, 512>}, {pipeline_mode = #tpu.pipeline_mode<synchronous>, transform_indices = @transform_3, window_bounds = array<i64: 1, 512>}, {pipeline_mode = #tpu.pipeline_mode<synchronous>, transform_indices = @transform_4, window_bounds = array<i64: 1, 512>}, {pipeline_mode = #tpu.pipeline_mode<synchronous>, transform_indices = @transform_5, window_bounds = array<i64: 512, 128>}, {pipeline_mode = #tpu.pipeline_mode<synchronous>, transform_indices = @transform_6, window_bounds = array<i64: 1, 128>}, {transform_indices = @transform_7, window_bounds = array<i64: 16, 128>}]} {
    %c0 = arith.constant 0 : index
    %c0_0 = arith.constant 0 : index
    %0 = vector.load %arg1[%c0, %c0_0] : memref<16x128xf32, #tpu.memory_space<vmem>>, vector<16x128xf32>
    %c0_1 = arith.constant 0 : index
    %c0_2 = arith.constant 0 : index
    %1 = vector.load %arg2[%c0_1, %c0_2] : memref<128x512xf32, #tpu.memory_space<vmem>>, vector<128x512xf32>
    %cst = arith.constant dense<0.000000e+00> : vector<16x512xf32>
    %2 = tpu.matmul %0, %1, %cst {dimension_numbers = #tpu.dot_dimension_numbers<[1], [0], [0], [1], [0, 0, 1, 1], [], []>} : vector<16x128xf32>, vector<128x512xf32>, vector<16x512xf32> -> vector<16x512xf32>
    %c0_3 = arith.constant 0 : index
    %c0_4 = arith.constant 0 : index
    %3 = vector.load %arg3[%c0_3, %c0_4] : memref<1x512xf32, #tpu.memory_space<vmem>>, vector<1x512xf32>
    %4 = vector.broadcast %3 : vector<1x512xf32> to vector<16x512xf32>
    %5 = arith.addf %2, %4 : vector<16x512xf32>
    %cst_5 = arith.constant dense<0.000000e+00> : vector<16xf32>
    %6 = vector.multi_reduction <add>, %5, %cst_5 [1] : vector<16x512xf32> to vector<16xf32>
    %7 = vector.shape_cast %6 : vector<16xf32> to vector<16x1xf32>
    %cst_6 = arith.constant 5.120000e+02 : f32
    %8 = vector.broadcast %cst_6 : f32 to vector<16x1xf32>
    %9 = arith.divf %7, %8 : vector<16x1xf32>
    %10 = vector.broadcast %9 : vector<16x1xf32> to vector<16x512xf32>
    %11 = arith.subf %5, %10 : vector<16x512xf32>
    %12 = arith.mulf %11, %11 : vector<16x512xf32>
    %cst_7 = arith.constant dense<0.000000e+00> : vector<16xf32>
    %13 = vector.multi_reduction <add>, %12, %cst_7 [1] : vector<16x512xf32> to vector<16xf32>
    %14 = vector.shape_cast %13 : vector<16xf32> to vector<16x1xf32>
    %cst_8 = arith.constant 5.120000e+02 : f32
    %15 = vector.broadcast %cst_8 : f32 to vector<16x1xf32>
    %16 = arith.divf %14, %15 : vector<16x1xf32>
    %17 = vector.broadcast %9 : vector<16x1xf32> to vector<16x512xf32>
    %18 = arith.subf %5, %17 : vector<16x512xf32>
    %cst_9 = arith.constant 9.99999974E-6 : f32
    %19 = vector.broadcast %cst_9 : f32 to vector<16x1xf32>
    %20 = arith.addf %16, %19 : vector<16x1xf32>
    %21 = math.rsqrt %20 : vector<16x1xf32>
    %22 = vector.broadcast %21 : vector<16x1xf32> to vector<16x512xf32>
    %23 = arith.mulf %18, %22 : vector<16x512xf32>
    %c0_10 = arith.constant 0 : index
    %c0_11 = arith.constant 0 : index
    %24 = vector.load %arg4[%c0_10, %c0_11] : memref<1x512xf32, #tpu.memory_space<vmem>>, vector<1x512xf32>
    %25 = vector.broadcast %24 : vector<1x512xf32> to vector<16x512xf32>
    %26 = arith.mulf %23, %25 : vector<16x512xf32>
    %c0_12 = arith.constant 0 : index
    %c0_13 = arith.constant 0 : index
    %27 = vector.load %arg5[%c0_12, %c0_13] : memref<1x512xf32, #tpu.memory_space<vmem>>, vector<1x512xf32>
    %28 = vector.broadcast %27 : vector<1x512xf32> to vector<16x512xf32>
    %29 = arith.addf %26, %28 : vector<16x512xf32>
    %cst_14 = arith.constant 0.000000e+00 : f32
    %30 = vector.broadcast %cst_14 : f32 to vector<16x512xf32>
    %31 = arith.maximumf %29, %30 : vector<16x512xf32>
    %c0_15 = arith.constant 0 : index
    %c0_16 = arith.constant 0 : index
    %32 = vector.load %arg6[%c0_15, %c0_16] : memref<512x128xf32, #tpu.memory_space<vmem>>, vector<512x128xf32>
    %cst_17 = arith.constant dense<0.000000e+00> : vector<16x128xf32>
    %33 = tpu.matmul %31, %32, %cst_17 {dimension_numbers = #tpu.dot_dimension_numbers<[1], [0], [0], [1], [0, 0, 1, 1], [], []>} : vector<16x512xf32>, vector<512x128xf32>, vector<16x128xf32> -> vector<16x128xf32>
    %c0_18 = arith.constant 0 : index
    %c0_19 = arith.constant 0 : index
    %34 = vector.load %arg7[%c0_18, %c0_19] : memref<1x128xf32, #tpu.memory_space<vmem>>, vector<1x128xf32>
    %35 = vector.broadcast %34 : vector<1x128xf32> to vector<16x128xf32>
    %36 = arith.addf %33, %35 : vector<16x128xf32>
    %c0_20 = arith.constant 0 : index
    %c0_21 = arith.constant 0 : index
    %37 = vector.load %arg8[%c0_20, %c0_21] : memref<16x128xf32, #tpu.memory_space<vmem>>, vector<16x128xf32>
    tpu.vector_store %arg8[%c0_20, %c0_21], %36 {strides = array<i32>} : memref<16x128xf32, #tpu.memory_space<vmem>>, vector<16x128xf32>,
    return
  }
  func.func @transform_0(%arg0: i32) -> (i32, i32) {
    %c0_i32 = arith.constant 0 : i32
    %c0_i32_0 = arith.constant 0 : i32
    return %arg0, %c0_i32 : i32, i32
  }
  func.func @transform_1(%arg0: i32) -> (i32, i32) {
    %c0_i32 = arith.constant 0 : i32
    %c0_i32_0 = arith.constant 0 : i32
    %c0_i32_1 = arith.constant 0 : i32
    return %c0_i32, %c0_i32_0 : i32, i32
  }
  func.func @transform_2(%arg0: i32) -> (i32, i32) {
    %c0_i32 = arith.constant 0 : i32
    %c0_i32_0 = arith.constant 0 : i32
    %c0_i32_1 = arith.constant 0 : i32
    return %c0_i32, %c0_i32_0 : i32, i32
  }
  func.func @transform_3(%arg0: i32) -> (i32, i32) {
    %c0_i32 = arith.constant 0 : i32
    %c0_i32_0 = arith.constant 0 : i32
    %c0_i32_1 = arith.constant 0 : i32
    return %c0_i32, %c0_i32_0 : i32, i32
  }
  func.func @transform_4(%arg0: i32) -> (i32, i32) {
    %c0_i32 = arith.constant 0 : i32
    %c0_i32_0 = arith.constant 0 : i32
    %c0_i32_1 = arith.constant 0 : i32
    return %c0_i32, %c0_i32_0 : i32, i32
  }
  func.func @transform_5(%arg0: i32) -> (i32, i32) {
    %c0_i32 = arith.constant 0 : i32
    %c0_i32_0 = arith.constant 0 : i32
    %c0_i32_1 = arith.constant 0 : i32
    return %c0_i32, %c0_i32_0 : i32, i32
  }
  func.func @transform_6(%arg0: i32) -> (i32, i32) {
    %c0_i32 = arith.constant 0 : i32
    %c0_i32_0 = arith.constant 0 : i32
    %c0_i32_1 = arith.constant 0 : i32
    return %c0_i32, %c0_i32_0 : i32, i32
  }
  func.func @transform_7(%arg0: i32) -> (i32, i32) {
    %c0_i32 = arith.constant 0 : i32
    %c0_i32_0 = arith.constant 0 : i32
    return %arg0, %c0_i32 : i32, i32
  }
}

</mosaic_0001>

<bundles_post_ra>
// kernel: position_wise_ffn.1
= control target key start
LH: loop header
LB: loop body
LE: loop exit
PB: predicated region body
PF: predicated region fallthrough
CT: control target
= control target key end

     0   :  { %12 = vsyncpa [#allocation3], 0  ;;  %s994_s0 = inlined_call_operand.hbm [shape: f32[16,128], index: 0, kind: input, shape index: {}]   ;;  %s995_s1 = inlined_call_operand.hbm [shape: f32[128,512], index: 1, kind: input, shape index: {}]   ;;  %s996_s2 = inlined_call_operand.vmem [shape: f32[1,512], index: 2, kind: input, shape index: {}]   ;;  %s997_s3 = inlined_call_operand.vmem [shape: f32[1,512], index: 3, kind: input, shape index: {}]   ;;  %s998_s4 = inlined_call_operand.vmem [shape: f32[1,512], index: 4, kind: input, shape index: {}]   ;;  %s999_s5 = inlined_call_operand.hbm [shape: f32[512,128], index: 5, kind: input, shape index: {}]   ;;  %s1000_s6 = inlined_call_operand.vmem [shape: f32[1,128], index: 6, kind: input, shape index: {}]   ;;  %s1001_s7 = inlined_call_operand.hbm [shape: f32[16,128], index: 7, kind: output, shape index: {}]  }
   0x1   :  { %13 = vsyncpa [#allocation6], 0 }
   0x2   :  { %14 = vsyncpa [#allocation4], 0  ;;  %s848_s24 = smov [#allocation5]  }
   0x3   :  { %s32_s25 = sshll.u32 %s848_s24, 4  ;;  %s33_s25 = int_to_ptr.vmem [resolvable:$true] %s32_s25 }
   0x4   :  { %s770_s26 = scalar_lea.vmem %s33_s25, 8192  ;;  %p775_p1 = scmp.lt.s32.totalorder %s33_s25, %s33_s25 }
   0x5   :  { %p771_p0 = scmp.ne.s32.totalorder %s33_s25, %s770_s26  ;;  %p776_p2 = scmp.lt.s32.totalorder %s770_s26, %s770_s26 }
   0x7   :  { %p777_p3 = por %p776_p2, %p775_p1 }
   0x9   :  { %p778_p4 = pnand %p777_p3, %p771_p0 }
   0xb   :  { %781 = shalt.err (!%p778_p4)
}
   0xc   :  { %s849_s27 = smov 512   ;;  %s850_s28 = smov 32  }
   0xd   :  { %38 = dma.hbm_to_vmem [thread:$0]  %s995_s1, 8192, %s33_s25, [#allocation6], %s849_s27, %s849_s27, %s850_s28  }
   0xe   :  { %s851_s8 = smov [#allocation2]  }
   0xf   :  { %s20_s9 = sshll.u32 %s851_s8, 4  ;;  %s21_s9 = int_to_ptr.vmem [resolvable:$true] %s20_s9 }
  0x10   :  { %s790_s10 = scalar_lea.vmem %s21_s9, 256  ;;  %p795_p6 = scmp.lt.s32.totalorder %s21_s9, %s21_s9 }
  0x11   :  { %p791_p5 = scmp.ne.s32.totalorder %s21_s9, %s790_s10  ;;  %p796_p7 = scmp.lt.s32.totalorder %s790_s10, %s790_s10 }
  0x13   :  { %p797_p8 = por %p796_p7, %p795_p6 }
  0x15   :  { %p798_p9 = pnand %p797_p8, %p791_p5 }
  0x17   :  { %801 = shalt.err (!%p798_p9)
}
  0x18   :  { %s852_s11 = smov 128   ;;  %s853_s12 = smov 8  }
  0x19   :  { %26 = dma.hbm_to_vmem [thread:$0]  %s994_s0, 256, %s21_s9, [#allocation3], %s852_s11, %s852_s11, %s853_s12  }
  0x1a   :  { %s854_s1 = smov [#allocation7]  }
  0x1b   :  { %s50_s15 = sshll.u32 %s854_s1, 4  ;;  %s51_s15 = int_to_ptr.vmem [resolvable:$true] %s50_s15 }
  0x1c   :  { %s810_s16 = scalar_lea.vmem %s51_s15, 8192  ;;  %p815_p11 = scmp.lt.s32.totalorder %s51_s15, %s51_s15 }
  0x1d   :  { %p811_p10 = scmp.ne.s32.totalorder %s51_s15, %s810_s16  ;;  %p816_p12 = scmp.lt.s32.totalorder %s810_s16, %s810_s16 }
  0x1f   :  { %p817_p13 = por %p816_p12, %p815_p11 }
  0x21   :  { %p818_p0 = pnand %p817_p13, %p811_p10 }
  0x23   :  { %821 = shalt.err (!%p818_p0)
}
  0x24   :  { %56 = dma.hbm_to_vmem [thread:$0]  %s999_s5, 8192, %s51_s15, [#allocation6], %s852_s11, %s852_s11, %s853_s12  }
  0x25   :  { %842 = dma.done.wait [#allocation3], 256  }
  0x26   :  { %843 = vsyncadd [#allocation3], 4294967040 }
  0x27   :  { %844 = dma.done.wait [#allocation6], 16384  }
  0x28   :  { %845 = vsyncadd [#allocation6], 4294950912  ;;  %v855_v0 = vmov 0.0   ;;  %v131_v1 = vld [vmem:[#allocation5 + $0x1e8] sm:$0xff]  ;;  %v130_v2 = vld [vmem:[#allocation5 + $0x1e0] sm:$0xff]  ;;  %s856_s22 = smov [#allocation8]  }
  0x29   :  { %220 = vmatprep.mubr.f32.mxu0 %v855_v0  ;;  %297 = vmatprep.mubr.f32.mxu1 %v855_v0  ;;  %v127_v3 = vld [vmem:[#allocation5 + $0x1c8] sm:$0xff]  ;;  %v133_v4 = vld [vmem:[#allocation5 + $0x1f8] sm:$0xff]  ;;  %v126_v5 = vld [vmem:[#allocation5 + $0x1c0] sm:$0xff]  ;;  %s659_s23 = sshll.u32 %s856_s22, 4  ;;  %s660_s23 = int_to_ptr.vmem [resolvable:$true] %s659_s23 }
  0x2a   :  { %156 = vmatprep.subr.mxu0 %v131_v1  ;;  %v132_v6 = vld [vmem:[#allocation5 + $0x1f0] sm:$0xff]  ;;  %233 = vmatprep.subr.mxu1 %v133_v4  ;;  %v123_v7 = vld [vmem:[#allocation5 + $0x1a8] sm:$0xff]  ;;  %v129_v8 = vld [vmem:[#allocation5 + $0x1d8] sm:$0xff]  ;;  %v136_v4 = vlaneseq  ;;  %p827_p2 = scmp.lt.s32.totalorder %s660_s23, %s660_s23 }
  0x2b   :  { %157 = vmatpush1.msra.mxu0 %v130_v2  ;;  %234 = vmatpush1.msra.mxu1 %v132_v6  ;;  %v122_v9 = vld [vmem:[#allocation5 + $0x1a0] sm:$0xff]  ;;  %v128_v10 = vld [vmem:[#allocation5 + $0x1d0] sm:$0xff]  ;;  %v125_v11 = vld [vmem:[#allocation5 + $0x1b8] sm:$0xff] }
  0x2c   :  { %158 = vmatprep.subr.mxu0 %v127_v3  ;;  %235 = vmatprep.subr.mxu1 %v129_v8  ;;  %v119_v12 = vld [vmem:[#allocation5 + $0x188] sm:$0xff]  ;;  %v124_v13 = vld [vmem:[#allocation5 + $0x1b0] sm:$0xff]  ;;  %v118_v14 = vld [vmem:[#allocation5 + $0x180] sm:$0xff] }
  0x2d   :  { %159 = vmatpush1.msra.mxu0 %v126_v5  ;;  %236 = vmatpush1.msra.mxu1 %v128_v10  ;;  %v121_v15 = vld [vmem:[#allocation5 + $0x198] sm:$0xff]  ;;  %v115_v16 = vld [vmem:[#allocation5 + $0x168] sm:$0xff]  ;;  %v120_v17 = vld [vmem:[#allocation5 + $0x190] sm:$0xff]  ;;  %v137_v5 = vshrl.u32 %v136_v4, 7 }
  0x2e   :  { %160 = vmatprep.subr.mxu0 %v123_v7  ;;  %237 = vmatprep.subr.mxu1 %v125_v11  ;;  %v114_v18 = vld [vmem:[#allocation5 + $0x160] sm:$0xff]  ;;  %v117_v19 = vld [vmem:[#allocation5 + $0x178] sm:$0xff]  ;;  %v111_v20 = vld [vmem:[#allocation5 + $0x148] sm:$0xff] }
  0x2f   :  { %161 = vmatpush1.msra.mxu0 %v122_v9  ;;  %238 = vmatpush1.msra.mxu1 %v124_v13  ;;  %v116_v21 = vld [vmem:[#allocation5 + $0x170] sm:$0xff]  ;;  %v110_v22 = vld [vmem:[#allocation5 + $0x140] sm:$0xff]  ;;  %v113_v23 = vld [vmem:[#allocation5 + $0x158] sm:$0xff]  ;;  %v916_v6 = vsub.s32 0, %v137_v5  ;;  %v918_v7 = vsub.s32 1, %v137_v5  ;;  %v920_v8 = vsub.s32 2, %v137_v5 }
  0x30   :  { %162 = vmatprep.subr.mxu0 %v119_v12  ;;  %239 = vmatprep.subr.mxu1 %v121_v15  ;;  %v107_v24 = vld [vmem:[#allocation5 + $0x128] sm:$0xff]  ;;  %v112_v25 = vld [vmem:[#allocation5 + $0x150] sm:$0xff]  ;;  %v106_v26 = vld [vmem:[#allocation5 + $0x120] sm:$0xff]  ;;  %v925_v10 = vsub.s32 3, %v137_v5 }
  0x31   :  { %163 = vmatpush1.msra.mxu0 %v118_v14  ;;  %240 = vmatpush1.msra.mxu1 %v120_v17  ;;  %v109_v27 = vld [vmem:[#allocation5 + $0x138] sm:$0xff]  ;;  %v103_v28 = vld [vmem:[#allocation5 + $0x108] sm:$0xff]  ;;  %v108_v29 = vld [vmem:[#allocation5 + $0x130] sm:$0xff] }
  0x32   :  { %164 = vmatprep.subr.mxu0 %v115_v16  ;;  %241 = vmatprep.subr.mxu1 %v117_v19  ;;  %v102_v30 = vld [vmem:[#allocation5 + $0x100] sm:$0xff]  ;;  %v105_v31 = vld [vmem:[#allocation5 + $0x118] sm:$0xff]  ;;  %v99_v32 = vld [vmem:[#allocation5 + $0xe8] sm:$0xff] }
  0x33   :  { %165 = vmatpush1.msra.mxu0 %v114_v18  ;;  %242 = vmatpush1.msra.mxu1 %v116_v21  ;;  %v104_v33 = vld [vmem:[#allocation5 + $0x110] sm:$0xff]  ;;  %v98_v34 = vld [vmem:[#allocation5 + $0xe0] sm:$0xff]  ;;  %v101_v35 = vld [vmem:[#allocation5 + $0xf8] sm:$0xff] }
  0x34   :  { %166 = vmatprep.subr.mxu0 %v111_v20  ;;  %243 = vmatprep.subr.mxu1 %v113_v23  ;;  %v95_v36 = vld [vmem:[#allocation5 + $0xc8] sm:$0xff]  ;;  %v100_v37 = vld [vmem:[#allocation5 + $0xf0] sm:$0xff]  ;;  %v94_v38 = vld [vmem:[#allocation5 + $0xc0] sm:$0xff] }
  0x35   :  { %167 = vmatpush1.msra.mxu0 %v110_v22  ;;  %244 = vmatpush1.msra.mxu1 %v112_v25  ;;  %v97_v39 = vld [vmem:[#allocation5 + $0xd8] sm:$0xff]  ;;  %v91_v40 = vld [vmem:[#allocation5 + $0xa8] sm:$0xff]  ;;  %v96_v41 = vld [vmem:[#allocation5 + $0xd0] sm:$0xff] }
  0x36   :  { %168 = vmatprep.subr.mxu0 %v107_v24  ;;  %245 = vmatprep.subr.mxu1 %v109_v27  ;;  %v90_v42 = vld [vmem:[#allocation5 + $0xa0] sm:$0xff]  ;;  %v93_v43 = vld [vmem:[#allocation5 + $0xb8] sm:$0xff]  ;;  %v87_v44 = vld [vmem:[#allocation5 + $0x88] sm:$0xff] }
  0x37   :  { %169 = vmatpush1.msra.mxu0 %v106_v26  ;;  %246 = vmatpush1.msra.mxu1 %v108_v29  ;;  %v92_v45 = vld [vmem:[#allocation5 + $0xb0] sm:$0xff]  ;;  %v86_v46 = vld [vmem:[#allocation5 + $0x80] sm:$0xff]  ;;  %v89_v47 = vld [vmem:[#allocation5 + $0x98] sm:$0xff] }
  0x38   :  { %170 = vmatprep.subr.mxu0 %v103_v28  ;;  %247 = vmatprep.subr.mxu1 %v105_v31  ;;  %v83_v48 = vld [vmem:[#allocation5 + $0x68] sm:$0xff]  ;;  %v88_v49 = vld [vmem:[#allocation5 + $0x90] sm:$0xff]  ;;  %v82_v50 = vld [vmem:[#allocation5 + $0x60] sm:$0xff] }
  0x39   :  { %171 = vmatpush1.msra.mxu0 %v102_v30  ;;  %248 = vmatpush1.msra.mxu1 %v104_v33  ;;  %v85_v51 = vld [vmem:[#allocation5 + $0x78] sm:$0xff]  ;;  %v79_v52 = vld [vmem:[#allocation5 + $0x48] sm:$0xff]  ;;  %v84_v53 = vld [vmem:[#allocation5 + $0x70] sm:$0xff] }
  0x3a   :  { %172 = vmatprep.subr.mxu0 %v99_v32  ;;  %249 = vmatprep.subr.mxu1 %v101_v35  ;;  %v78_v54 = vld [vmem:[#allocation5 + $0x40] sm:$0xff]  ;;  %v81_v55 = vld [vmem:[#allocation5 + $0x58] sm:$0xff]  ;;  %v75_v56 = vld [vmem:[#allocation5 + $0x28] sm:$0xff] }
  0x3b   :  { %173 = vmatpush1.msra.mxu0 %v98_v34  ;;  %250 = vmatpush1.msra.mxu1 %v100_v37  ;;  %v80_v57 = vld [vmem:[#allocation5 + $0x50] sm:$0xff]  ;;  %v74_v58 = vld [vmem:[#allocation5 + $0x20] sm:$0xff]  ;;  %v77_v59 = vld [vmem:[#allocation5 + $0x38] sm:$0xff] }
  0x3c   :  { %174 = vmatprep.subr.mxu0 %v95_v36  ;;  %251 = vmatprep.subr.mxu1 %v97_v39  ;;  %v71_v60 = vld [vmem:[#allocation5 + $0x8] sm:$0xff]  ;;  %v76_v61 = vld [vmem:[#allocation5 + $0x30] sm:$0xff]  ;;  %v70_v62 = vld [vmem:[#allocation5] sm:$0xff] }
  0x3d   :  { %175 = vmatpush1.msra.mxu0 %v94_v38  ;;  %252 = vmatpush1.msra.mxu1 %v96_v41  ;;  %v73_v63 = vld [vmem:[#allocation5 + $0x18] sm:$0xff]  ;;  %v68_v1 = vld [vmem:[#allocation2] sm:$0xff] }
  0x3e   :  { %176 = vmatprep.subr.mxu0 %v91_v40  ;;  %253 = vmatprep.subr.mxu1 %v93_v43  ;;  %v72_v2 = vld [vmem:[#allocation5 + $0x10] sm:$0xff]  ;;  %v69_v3 = vld [vmem:[#allocation2 + $0x8] sm:$0xff] }
  0x3f   :  { %177 = vmatpush1.msra.mxu0 %v90_v42  ;;  %254 = vmatpush1.msra.mxu1 %v92_v45  ;;  %v134_v9 = vld [vmem:[%s996_s2] sm:$0xf]  ;;  %v462_v36 = vld [vmem:[#allocation7 + $0xf8] sm:$0xff]  ;;  %v492_v45 = vld [vmem:[#allocation7 + $0x1e8] sm:$0xff] }
  0x40   :  { %178 = vmatprep.subr.mxu0 %v87_v44  ;;  %255 = vmatprep.subr.mxu1 %v89_v47  ;;  %v139_v11 = vrot.slane %v134_v9, %v916_v6  ;;  %v147_v12 = vrot.slane %v134_v9, %v920_v8  ;;  %v151_v16 = vrot.slane %v134_v9, %v925_v10  ;;  %v494_v37 = vld [vmem:[#allocation7 + $0x1f8] sm:$0xff]  ;;  %v461_v40 = vld [vmem:[#allocation7 + $0xf0] sm:$0xff]  ;;  %v460_v44 = vld [vmem:[#allocation7 + $0xe8] sm:$0xff] }
  0x41   :  { %179 = vmatpush1.msra.mxu0 %v86_v46  ;;  %256 = vmatpush1.msra.mxu1 %v88_v49  ;;  %v446_v38 = vld [vmem:[#allocation7 + $0x78] sm:$0xff]  ;;  %v493_v41 = vld [vmem:[#allocation7 + $0x1f0] sm:$0xff] }
  0x42   :  { %180 = vmatprep.subr.mxu0 %v83_v48  ;;  %257 = vmatprep.subr.mxu1 %v85_v51  ;;  %v478_v39 = vld [vmem:[#allocation7 + $0x178] sm:$0xff]  ;;  %v445_v42 = vld [vmem:[#allocation7 + $0x70] sm:$0xff] }
  0x43   :  { %181 = vmatpush1.msra.mxu0 %v82_v50  ;;  %258 = vmatpush1.msra.mxu1 %v84_v53  ;;  %v477_v43 = vld [vmem:[#allocation7 + $0x170] sm:$0xff] }
  0x44   :  { %182 = vmatprep.subr.mxu0 %v79_v52  ;;  %259 = vmatprep.subr.mxu1 %v81_v55 }
  0x45   :  { %183 = vmatpush1.msra.mxu0 %v78_v54  ;;  %260 = vmatpush1.msra.mxu1 %v80_v57 }
  0x46   :  { %184 = vmatprep.subr.mxu0 %v75_v56  ;;  %261 = vmatprep.subr.mxu1 %v77_v59 }
  0x47   :  { %185 = vmatpush1.msra.mxu0 %v74_v58  ;;  %262 = vmatpush1.msra.mxu1 %v76_v61 }
  0x48   :  { %186 = vmatprep.subr.mxu0 %v71_v60  ;;  %263 = vmatprep.subr.mxu1 %v73_v63 }
  0x49   :  { %187 = vmatpush1.msra.mxu0 %v70_v62  ;;  %264 = vmatpush1.msra.mxu1 %v72_v2 }
  0x4a   :  { %221 = vmatmul.mubr.f32.vlgmr.msra.gmra.mxu0 %v68_v1  ;;  %298 = vmatmul.mubr.f32.vlgmr.msra.gmra.mxu1 %v68_v1 }
  0x4b   :  { %226 = vmatprep.mubr.f32.mxu0 %v855_v0  ;;  %303 = vmatprep.mubr.f32.mxu1 %v855_v0  ;;  %v143_v0 = vrot.slane %v134_v9, %v918_v7 }
  0x4c   :  { %673 = vmatprep.subr.mxu0 %v462_v36  ;;  %711 = vmatprep.subr.mxu1 %v494_v37  ;;  %v438_v36 = vld [vmem:[#allocation7 + $0x38] sm:$0xff] }
  0x4d   :  { %674 = vmatpush3.msra.mxu0 %v446_v38  ;;  %712 = vmatpush3.msra.mxu1 %v478_v39  ;;  %v470_v37 = vld [vmem:[#allocation7 + $0x138] sm:$0xff]  ;;  %v453_v38 = vld [vmem:[#allocation7 + $0xb0] sm:$0xff] }
  0x4e   :  { %227 = vmatmul.mubr.f32.gmra.mxu0 %v69_v3  ;;  %304 = vmatmul.mubr.f32.gmra.mxu1 %v69_v3  ;;  %v485_v39 = vld [vmem:[#allocation7 + $0x1b0] sm:$0xff] }
  0x4f   :  { %675 = vmatprep.subr.mxu0 %v461_v40  ;;  %713 = vmatprep.subr.mxu1 %v493_v41  ;;  %v437_v40 = vld [vmem:[#allocation7 + $0x30] sm:$0xff] }
  0x50   :  { %676 = vmatpush3.msra.mxu0 %v445_v42  ;;  %714 = vmatpush3.msra.mxu1 %v477_v43  ;;  %v469_v41 = vld [vmem:[#allocation7 + $0x130] sm:$0xff]  ;;  %v452_v42 = vld [vmem:[#allocation7 + $0xa8] sm:$0xff] }
  0x51   :  { %677 = vmatprep.subr.mxu0 %v460_v44  ;;  %715 = vmatprep.subr.mxu1 %v492_v45  ;;  %v484_v43 = vld [vmem:[#allocation7 + $0x1a8] sm:$0xff] }
  0x52   :  { %v436_v44 = vld [vmem:[#allocation7 + $0x28] sm:$0xff] }
  0x53   :  { %v468_v45 = vld [vmem:[#allocation7 + $0x128] sm:$0xff] }
 0x10a   :  { %v222_v13 = vpop.f32.mrf.mxu0  ;;  %v299_v14 = vpop.f32.mrf.mxu1 }
 0x10b   :  { %v223_v17 = vadd.f32 %v222_v13, %v139_v11  ;;  %v300_v19 = vadd.f32 %v299_v14, %v147_v12  ;;  %v476_v13 = vld [vmem:[#allocation7 + $0x168] sm:$0xff]  ;;  %v459_v14 = vld [vmem:[#allocation7 + $0xe0] sm:$0xff] }
 0x10c   :  { %v224_v15 = vpop.f32.mrf.mxu0  ;;  %v301_v20 = vpop.f32.mrf.mxu1  ;;  %716 = vmatpush3.msra.mxu1 %v476_v13  ;;  %v463_v13 = vld [vmem:[#allocation7 + $0x100] sm:$0xff] }
 0x10d   :  { %v225_v18 = vadd.f32 %v224_v15, %v143_v0  ;;  %v302_v24 = vadd.f32 %v301_v20, %v151_v16  ;;  %v491_v15 = vld [vmem:[#allocation7 + $0x1e0] sm:$0xff]  ;;  %v442_v20 = vld [vmem:[#allocation7 + $0x58] sm:$0xff] }
 0x10e   :  { %v228_v21 = vpop.f32.mrf.mxu0  ;;  %v305_v23 = vpop.f32.mrf.mxu1  ;;  %717 = vmatprep.subr.mxu1 %v491_v15 }
 0x10f   :  { %v310_v22 = vadd.f32 %v225_v18, %v223_v17  ;;  %v229_v26 = vadd.f32 %v228_v21, %v139_v11  ;;  %v306_v28 = vadd.f32 %v305_v23, %v147_v12  ;;  %v444_v12 = vld [vmem:[#allocation7 + $0x68] sm:$0xff]  ;;  %v474_v21 = vld [vmem:[#allocation7 + $0x158] sm:$0xff]  ;;  %v489_v23 = vld [vmem:[#allocation7 + $0x1d0] sm:$0xff] }
 0x110   :  { %v230_v25 = vpop.f32.mrf.mxu0  ;;  %v307_v30 = vpop.f32.mrf.mxu1  ;;  %678 = vmatpush3.msra.mxu0 %v444_v12  ;;  %v431_v12 = vld [vmem:[#allocation7] sm:$0xff] }
 0x111   :  { %v231_v27 = vadd.f32 %v230_v25, %v143_v0  ;;  %v311_v29 = vadd.f32 %v310_v22, %v300_v19  ;;  %v308_v34 = vadd.f32 %v307_v30, %v151_v16  ;;  %679 = vmatprep.subr.mxu0 %v459_v14  ;;  %v443_v16 = vld [vmem:[#allocation7 + $0x60] sm:$0xff]  ;;  %v457_v22 = vld [vmem:[#allocation7 + $0xd0] sm:$0xff] }
 0x112   :  { %680 = vmatpush3.msra.mxu0 %v443_v16  ;;  %v473_v25 = vld [vmem:[#allocation7 + $0x150] sm:$0xff]  ;;  %v455_v30 = vld [vmem:[#allocation7 + $0xc0] sm:$0xff] }
 0x113   :  { %v315_v31 = vadd.f32 %v231_v27, %v229_v26  ;;  %v312_v32 = vadd.f32 %v311_v29, %v302_v24  ;;  %v472_v29 = vld [vmem:[#allocation7 + $0x148] sm:$0xff] }
 0x115   :  { %v316_v33 = vadd.f32 %v315_v31, %v306_v28  ;;  %313 = vadd.xlane.f32.xlu0 %v312_v32  ;;  %v487_v31 = vld [vmem:[#allocation7 + $0x1c0] sm:$0xff] }
 0x116   :  { %v439_v32 = vld [vmem:[#allocation7 + $0x40] sm:$0xff] }
 0x117   :  { %v317_v35 = vadd.f32 %v316_v33, %v308_v34  ;;  %v471_v33 = vld [vmem:[#allocation7 + $0x140] sm:$0xff] }
 0x119   :  { %318 = vadd.xlane.f32.xlu0 %v317_v35  ;;  %v486_v35 = vld [vmem:[#allocation7 + $0x1b8] sm:$0xff] }
 0x19e   :  { %v314_v46 = vpop.xlane.xlu0 %313 }
 0x19f   :  { %v321_v47 = vmul.f32 0.001953125, %v314_v46  ;;  %v451_v46 = vld [vmem:[#allocation7 + $0xa0] sm:$0xff] }
 0x1a1   :  { %v931_v48 = vsub.f32 %v223_v17, %v321_v47  ;;  %v933_v49 = vsub.f32 %v225_v18, %v321_v47  ;;  %v935_v50 = vsub.f32 %v300_v19, %v321_v47  ;;  %v937_v52 = vsub.f32 %v302_v24, %v321_v47  ;;  %v475_v17 = vld [vmem:[#allocation7 + $0x160] sm:$0xff]  ;;  %v458_v18 = vld [vmem:[#allocation7 + $0xd8] sm:$0xff]  ;;  %v441_v24 = vld [vmem:[#allocation7 + $0x50] sm:$0xff] }
 0x1a2   :  { %v319_v51 = vpop.xlane.xlu0 %318  ;;  %718 = vmatpush3.msra.mxu1 %v475_v17  ;;  %v490_v19 = vld [vmem:[#allocation7 + $0x1d8] sm:$0xff]  ;;  %681 = vmatprep.subr.mxu0 %v458_v18  ;;  %v483_v47 = vld [vmem:[#allocation7 + $0x1a0] sm:$0xff] }
 0x1a3   :  { %v322_v53 = vmul.f32 0.001953125, %v319_v51  ;;  %v331_v54 = vmul.f32 %v931_v48, %v931_v48  ;;  %v332_v55 = vmul.f32 %v933_v49, %v933_v49  ;;  %v333_v56 = vmul.f32 %v935_v50, %v935_v50  ;;  %719 = vmatprep.subr.mxu1 %v490_v19  ;;  %682 = vmatpush3.msra.mxu0 %v442_v20  ;;  %v435_v51 = vld [vmem:[#allocation7 + $0x20] sm:$0xff]  ;;  %v363_v20 = vld [vmem:[%s997_s3] sm:$0xf] }
 0x1a4   :  { %v334_v61 = vmul.f32 %v937_v52, %v937_v52  ;;  %720 = vmatpush3.msra.mxu1 %v474_v21  ;;  %683 = vmatprep.subr.mxu0 %v457_v22  ;;  %v393_v21 = vld [vmem:[%s998_s4] sm:$0xf]  ;;  %v368_v22 = vrot.slane %v363_v20, %v916_v6 }
 0x1a5   :  { %v945_v57 = vsub.f32 %v229_v26, %v322_v53  ;;  %v947_v58 = vsub.f32 %v231_v27, %v322_v53  ;;  %v339_v59 = vadd.f32 %v332_v55, %v331_v54  ;;  %v949_v60 = vsub.f32 %v306_v28, %v322_v53  ;;  %721 = vmatprep.subr.mxu1 %v489_v23  ;;  %v456_v26 = vld [vmem:[#allocation7 + $0xc8] sm:$0xff]  ;;  %v450_v54 = vld [vmem:[#allocation7 + $0x98] sm:$0xff] }
 0x1a6   :  { %v953_v63 = vsub.f32 %v308_v34, %v322_v53  ;;  %684 = vmatpush3.msra.mxu0 %v441_v24  ;;  %722 = vmatpush3.msra.mxu1 %v473_v25  ;;  %v488_v27 = vld [vmem:[#allocation7 + $0x1c8] sm:$0xff]  ;;  %v454_v34 = vld [vmem:[#allocation7 + $0xb8] sm:$0xff]  ;;  %v467_v53 = vld [vmem:[#allocation7 + $0x120] sm:$0xff]  ;;  %v376_v23 = vrot.slane %v363_v20, %v920_v8  ;;  %v372_v24 = vrot.slane %v363_v20, %v918_v7 }
 0x1a7   :  { %v340_v62 = vadd.f32 %v339_v59, %v333_v56  ;;  %v335_v1 = vmul.f32 %v945_v57, %v945_v57  ;;  %v336_v2 = vmul.f32 %v947_v58, %v947_v58  ;;  %v337_v4 = vmul.f32 %v949_v60, %v949_v60  ;;  %685 = vmatprep.subr.mxu0 %v456_v26  ;;  %v440_v28 = vld [vmem:[#allocation7 + $0x48] sm:$0xff]  ;;  %v482_v55 = vld [vmem:[#allocation7 + $0x198] sm:$0xff] }
 0x1a8   :  { %v338_v9 = vmul.f32 %v953_v63, %v953_v63  ;;  %723 = vmatprep.subr.mxu1 %v488_v27  ;;  %686 = vmatpush3.msra.mxu0 %v440_v28  ;;  %v434_v56 = vld [vmem:[#allocation7 + $0x18] sm:$0xff]  ;;  %v380_v25 = vrot.slane %v363_v20, %v925_v10  ;;  %v402_v27 = vrot.slane %v393_v21, %v918_v7 }
 0x1a9   :  { %v341_v3 = vadd.f32 %v340_v62, %v334_v61  ;;  %v344_v5 = vadd.f32 %v336_v2, %v335_v1  ;;  %724 = vmatpush3.msra.mxu1 %v472_v29  ;;  %687 = vmatprep.subr.mxu0 %v455_v30  ;;  %v466_v59 = vld [vmem:[#allocation7 + $0x118] sm:$0xff]  ;;  %v449_v61 = vld [vmem:[#allocation7 + $0x90] sm:$0xff]  ;;  %v410_v28 = vrot.slane %v393_v21, %v925_v10 }
 0x1aa   :  { %725 = vmatprep.subr.mxu1 %v487_v31  ;;  %688 = vmatpush3.msra.mxu0 %v439_v32  ;;  %v481_v62 = vld [vmem:[#allocation7 + $0x190] sm:$0xff]  ;;  %v398_v29 = vrot.slane %v393_v21, %v916_v6  ;;  %v406_v30 = vrot.slane %v393_v21, %v920_v8 }
 0x1ab   :  { %342 = vadd.xlane.f32.xlu1 %v341_v3  ;;  %v345_v11 = vadd.f32 %v344_v5, %v337_v4  ;;  %726 = vmatpush3.msra.mxu1 %v471_v33  ;;  %v433_v1 = vld [vmem:[#allocation7 + $0x10] sm:$0xff]  ;;  %v448_v3 = vld [vmem:[#allocation7 + $0x88] sm:$0xff] }
 0x1ac   :  { %689 = vmatprep.subr.mxu0 %v454_v34  ;;  %727 = vmatprep.subr.mxu1 %v486_v35  ;;  %v465_v2 = vld [vmem:[#allocation7 + $0x110] sm:$0xff]  ;;  %v480_v4 = vld [vmem:[#allocation7 + $0x188] sm:$0xff] }
 0x1ad   :  { %v346_v0 = vadd.f32 %v345_v11, %v338_v9  ;;  %690 = vmatpush3.msra.mxu0 %v438_v36  ;;  %728 = vmatpush3.msra.mxu1 %v470_v37  ;;  %v432_v5 = vld [vmem:[#allocation7 + $0x8] sm:$0xff]  ;;  %v447_v11 = vld [vmem:[#allocation7 + $0x80] sm:$0xff] }
 0x1ae   :  { %691 = vmatprep.subr.mxu0 %v453_v38  ;;  %729 = vmatprep.subr.mxu1 %v485_v39  ;;  %v464_v9 = vld [vmem:[#allocation7 + $0x108] sm:$0xff] }
 0x1af   :  { %347 = vadd.xlane.f32.xlu1 %v346_v0  ;;  %692 = vmatpush3.msra.mxu0 %v437_v40  ;;  %v479_v0 = vld [vmem:[#allocation7 + $0x180] sm:$0xff] }
 0x1b0   :  { %730 = vmatpush3.msra.mxu1 %v469_v41  ;;  %693 = vmatprep.subr.mxu0 %v452_v42 }
 0x1b1   :  { %731 = vmatprep.subr.mxu1 %v484_v43  ;;  %694 = vmatpush3.msra.mxu0 %v436_v44 }
 0x1b2   :  { %732 = vmatpush3.msra.mxu1 %v468_v45  ;;  %695 = vmatprep.subr.mxu0 %v451_v46 }
 0x1b3   :  { %733 = vmatprep.subr.mxu1 %v483_v47  ;;  %696 = vmatpush3.msra.mxu0 %v435_v51 }
 0x1b4   :  { %734 = vmatpush3.msra.mxu1 %v467_v53  ;;  %697 = vmatprep.subr.mxu0 %v450_v54 }
 0x1b5   :  { %735 = vmatprep.subr.mxu1 %v482_v55  ;;  %698 = vmatpush3.msra.mxu0 %v434_v56 }
 0x1b6   :  { %736 = vmatpush3.msra.mxu1 %v466_v59  ;;  %699 = vmatprep.subr.mxu0 %v449_v61  ;;  %v672_v61 = vld [vmem:[%s1000_s6] ss:$0 sm:$0xff]  ;;  %s822_s6 = scalar_lea.vmem %s660_s23, 256 }
 0x1b7   :  { %737 = vmatprep.subr.mxu1 %v481_v62  ;;  %700 = vmatpush3.msra.mxu0 %v433_v1  ;;  %p823_p1 = scmp.ne.s32.totalorder %s660_s23, %s822_s6  ;;  %p828_p3 = scmp.lt.s32.totalorder %s822_s6, %s822_s6 }
 0x1b8   :  { %738 = vmatpush3.msra.mxu1 %v465_v2  ;;  %701 = vmatprep.subr.mxu0 %v448_v3 }
 0x1b9   :  { %739 = vmatprep.subr.mxu1 %v480_v4  ;;  %702 = vmatpush3.msra.mxu0 %v432_v5  ;;  %p829_p4 = por %p828_p3, %p827_p2 }
 0x1ba   :  { %740 = vmatpush3.msra.mxu1 %v464_v9  ;;  %703 = vmatprep.subr.mxu0 %v447_v11 }
 0x1bb   :  { %741 = vmatprep.subr.mxu1 %v479_v0  ;;  %704 = vmatpush3.msra.mxu0 %v431_v12  ;;  %p830_p5 = pnand %p829_p4, %p823_p1 }
 0x1bc   :  { %742 = vmatpush3.msra.mxu1 %v463_v13 }
 0x234   :  { %v343_v14 = vpop.xlane.xlu1 %342 }
 0x235   :  { %v349_v15 = vmul.f32 0.001953125, %v343_v14 }
 0x237   :  { %v351_v16 = vadd.f32 1e-05, %v349_v15 }
 0x238   :  { %v348_v17 = vpop.xlane.xlu1 %347 }
 0x239   :  { %758 = vrsqrt.f32 %v351_v16  ;;  %v350_v18 = vmul.f32 0.001953125, %v348_v17 }
 0x23b   :  { %v352_v19 = vadd.f32 1e-05, %v350_v18 }
 0x23d   :  { %760 = vrsqrt.f32 %v352_v19 }
 0x246   :  { %v759_v26 = vpop.eup %758 }
 0x247   :  { %v356_v31 = vmul.f32 %v759_v26, %v933_v49  ;;  %v358_v32 = vmul.f32 %v759_v26, %v937_v52  ;;  %v355_v33 = vmul.f32 %v759_v26, %v931_v48  ;;  %v357_v34 = vmul.f32 %v759_v26, %v935_v50 }
 0x249   :  { %v386_v35 = vmul.f32 %v372_v24, %v356_v31  ;;  %v388_v36 = vmul.f32 %v380_v25, %v358_v32  ;;  %v385_v37 = vmul.f32 %v368_v22, %v355_v33  ;;  %v387_v38 = vmul.f32 %v376_v23, %v357_v34 }
 0x24a   :  { %v761_v39 = vpop.eup %760 }
 0x24b   :  { %v416_v7 = vadd.f32 %v402_v27, %v386_v35  ;;  %v418_v40 = vadd.f32 %v410_v28, %v388_v36  ;;  %v415_v10 = vadd.f32 %v398_v29, %v385_v37  ;;  %v417_v41 = vadd.f32 %v406_v30, %v387_v38 }
 0x24c   :  { %v360_v6 = vmul.f32 %v761_v39, %v947_v58  ;;  %v362_v8 = vmul.f32 %v761_v39, %v953_v63  ;;  %v359_v49 = vmul.f32 %v761_v39, %v945_v57  ;;  %v361_v52 = vmul.f32 %v761_v39, %v949_v60 }
 0x24d   :  { %v424_v48 = vmax.f32 %v416_v7, 0.0  ;;  %v426_v42 = vmax.f32 %v418_v40, 0.0  ;;  %v423_v50 = vmax.f32 %v415_v10, 0.0  ;;  %v425_v43 = vmax.f32 %v417_v41, 0.0 }
 0x24e   :  { %v390_v44 = vmul.f32 %v372_v24, %v360_v6  ;;  %v392_v45 = vmul.f32 %v380_v25, %v362_v8  ;;  %v389_v46 = vmul.f32 %v368_v22, %v359_v49  ;;  %v391_v47 = vmul.f32 %v376_v23, %v361_v52 }
 0x24f   :  { %566 = vmatprep.mubr.f32.mxu0 %v424_v48  ;;  %641 = vmatprep.mubr.f32.mxu1 %v426_v42 }
 0x250   :  { %567 = vmatmul.mubr.f32.vlgmr.msra.gmra.mxu0 %v423_v50  ;;  %642 = vmatmul.mubr.f32.vlgmr.msra.gmra.mxu1 %v425_v43  ;;  %v420_v51 = vadd.f32 %v402_v27, %v390_v44  ;;  %v422_v58 = vadd.f32 %v410_v28, %v392_v45  ;;  %v419_v53 = vadd.f32 %v398_v29, %v389_v46 }
 0x251   :  { %v421_v63 = vadd.f32 %v406_v30, %v391_v47 }
 0x252   :  { %v428_v54 = vmax.f32 %v420_v51, 0.0  ;;  %v430_v57 = vmax.f32 %v422_v58, 0.0  ;;  %v427_v55 = vmax.f32 %v419_v53, 0.0 }
 0x253   :  { %v429_v60 = vmax.f32 %v421_v63, 0.0 }
 0x254   :  { %571 = vmatprep.mubr.f32.mxu0 %v428_v54  ;;  %646 = vmatprep.mubr.f32.mxu1 %v430_v57 }
 0x255   :  { %572 = vmatmul.mubr.f32.gmra.mxu0 %v427_v55  ;;  %647 = vmatmul.mubr.f32.gmra.mxu1 %v429_v60 }
 0x310   :  { %v705_v56 = vpop.f32.mrf.mxu0  ;;  %v743_v59 = vpop.f32.mrf.mxu1 }
 0x312   :  { %v706_v62 = vpop.f32.mrf.mxu0  ;;  %v744_v1 = vpop.f32.mrf.mxu1 }
 0x313   :  { %v707_v2 = vadd.f32 %v706_v62, %v705_v56  ;;  %v745_v4 = vadd.f32 %v744_v1, %v743_v59 }
 0x315   :  { %v569_v3 = vadd.f32 %v707_v2, %v672_v61  ;;  %v708_v5 = vpop.f32.mrf.mxu0  ;;  %v746_v9 = vpop.f32.mrf.mxu1 }
 0x317   :  { %v644_v11 = vadd.f32 %v745_v4, %v569_v3  ;;  %v709_v0 = vpop.f32.mrf.mxu0  ;;  %v747_v12 = vpop.f32.mrf.mxu1 }
 0x318   :  { %v710_v13 = vadd.f32 %v709_v0, %v708_v5  ;;  %v748_v15 = vadd.f32 %v747_v12, %v746_v9 }
 0x319   :  { %652 = vst [vmem:[#allocation8] sm:$0xff] %v644_v11 }
 0x31a   :  { %v574_v14 = vadd.f32 %v710_v13, %v672_v61 }
 0x31c   :  { %v649_v16 = vadd.f32 %v748_v15, %v574_v14 }
 0x31e   :  { %653 = vst [vmem:[#allocation8 + $0x8] sm:$0xff] %v649_v16 }
 0x31f   :  { %833 = shalt.err (!%p830_p5)
}
 0x320   :  { %665 = dma.vmem_to_hbm [thread:$0]  %s660_s23, 256, %s1001_s7, [#allocation4], %s852_s11, %s852_s11, %s853_s12  }
 0x321   :  { %846 = dma.done.wait [#allocation4], 256  }
 0x322   :  { %847 = vsyncadd [#allocation4], 4294967040 }
 0x323   :  { %669 = vsyncpa [#allocation3], 1 }
 0x324   :  { %670 = vsyncpa [#allocation6], 1 }
 0x325   :  { %671 = vsyncpa [#allocation4], 1 }

</bundles_post_ra>
